<compile_context>
chip_gen: v7x
topology: tpu7x:2x2x1
jax: 0.10.0
libtpu: 0.0.40
codegen_flags: <defaults>
</compile_context>

<pallas_src>
import functools

import jax
import jax.numpy as jnp
from jax.experimental import pallas as pl
from jax.experimental.pallas import tpu as pltpu

HIDDEN = 256
OUT_PAD = 128          # lane-dense padded width of the action head
LN_EPS = 1e-5


def _round_up(v, m):
    return ((v + m - 1) // m) * m


def _layernorm_relu(h, gamma, beta):
    # Fused-stats LayerNorm (biased variance, like nn.LayerNorm): mean and
    # mean-of-squares are independent reductions (no (h - mu) dependency
    # chain). Clamp guards tiny negative values from cancellation.
    mu = jnp.mean(h, axis=-1, keepdims=True)
    ms = jnp.mean(h * h, axis=-1, keepdims=True)
    var = jnp.maximum(ms - mu * mu, 0.0)
    hn = (h - mu) * jax.lax.rsqrt(var + LN_EPS)
    return jnp.maximum(hn * gamma + beta, 0.0)


def actor_kernel(x_ref, w1_ref, w23_ref, wout_ref, vec_ref, out_ref, *,
                 max_action, n_sub):
    # x_ref:    (block_m, obs_dim)    batch tile (f32)
    # w1_ref:   (obs_dim, 256)        bf16
    # w23_ref:  (2, 256, 256)         bf16  fc2 / fc3 weight stack
    # wout_ref: (256, OUT_PAD)        bf16  action head, zero-padded columns
    # vec_ref:  (10, 256)  f32 rows: b1,g1,be1, b2,g2,be2, b3,g3,be3, b_out(pad)
    bm = out_ref.shape[0]
    sub = bm // n_sub

    b1, g1, be1 = vec_ref[0:1, :], vec_ref[1:2, :], vec_ref[2:3, :]
    b2, g2, be2 = vec_ref[3:4, :], vec_ref[4:5, :], vec_ref[5:6, :]
    b3, g3, be3 = vec_ref[6:7, :], vec_ref[7:8, :], vec_ref[8:9, :]
    bo = vec_ref[9:10, :OUT_PAD]

    w1 = w1_ref[...]
    w2 = w23_ref[0]
    w3 = w23_ref[1]
    wo = wout_ref[...]

    # Two independent per-half chains -> the scheduler overlaps one half's
    # matmul (MXU) with the other half's LayerNorm/ReLU (VPU/XLU/EUP).
    xs = [x_ref[i * sub:(i + 1) * sub, :].astype(jnp.bfloat16)
          for i in range(n_sub)]

    hs = [jnp.dot(x, w1, preferred_element_type=jnp.float32) + b1 for x in xs]
    hs = [_layernorm_relu(h, g1, be1) for h in hs]

    hs = [jnp.dot(h.astype(jnp.bfloat16), w2,
                  preferred_element_type=jnp.float32) + b2 for h in hs]
    hs = [_layernorm_relu(h, g2, be2) for h in hs]

    hs = [jnp.dot(h.astype(jnp.bfloat16), w3,
                  preferred_element_type=jnp.float32) + b3 for h in hs]
    hs = [_layernorm_relu(h, g3, be3) for h in hs]

    for i, h in enumerate(hs):
        a = jnp.dot(h.astype(jnp.bfloat16), wo,
                    preferred_element_type=jnp.float32) + bo
        out_ref[i * sub:(i + 1) * sub, :] = (
            max_action * jnp.tanh(a)).astype(out_ref.dtype)


def make_actor_params(key, obs_dim, act_dim):
    """Synthetic init mirroring the PyTorch __init__ uniform bounds (packed)."""
    assert act_dim <= OUT_PAD
    ks = jax.random.split(key, 7)

    def uniform(k, shape, bound):
        return jax.random.uniform(k, shape, jnp.float32, -bound, bound)

    # PyTorch: f = 1/sqrt(weight.size(0)) = 1/sqrt(256) for fc1/fc2/fc3; the
    # action head keeps the default nn.Linear bound ~ 1/sqrt(256) as well.
    f = 1.0 / jnp.sqrt(float(HIDDEN))

    w1 = uniform(ks[0], (obs_dim, HIDDEN), f).astype(jnp.bfloat16)
    w23 = uniform(ks[1], (2, HIDDEN, HIDDEN), f).astype(jnp.bfloat16)

    wout = jnp.zeros((HIDDEN, OUT_PAD), jnp.float32)
    wout = wout.at[:, :act_dim].set(uniform(ks[2], (HIDDEN, act_dim), f))
    wout = wout.astype(jnp.bfloat16)

    vec = jnp.zeros((10, HIDDEN), jnp.float32)
    vec = vec.at[0, :].set(uniform(ks[3], (HIDDEN,), f))           # b1
    vec = vec.at[1, :].set(1.0)                                    # gamma1 (beta1 = 0)
    vec = vec.at[3, :].set(uniform(ks[4], (HIDDEN,), f))           # b2
    vec = vec.at[4, :].set(1.0)                                    # gamma2
    vec = vec.at[6, :].set(uniform(ks[5], (HIDDEN,), f))           # b3
    vec = vec.at[7, :].set(1.0)                                    # gamma3
    vec = vec.at[9, :act_dim].set(uniform(ks[6], (act_dim,), f))   # b_out (padded)

    return dict(w1=w1, w23=w23, wout=wout, vec=vec)


@functools.partial(jax.jit, static_argnames=("max_action", "act_dim", "block_m"))
def actor_forward(x, params, *, max_action, act_dim, block_m=512):
    x = x.astype(jnp.float32)
    B, obs_dim = x.shape
    assert params["w1"].shape[0] == obs_dim

    # Tile-size policy:
    #  * >=2 grid steps whenever B > 8 (megacore sharding on v7x),
    #  * sublane (8) multiple, floor 8, cap at requested block_m.
    b8 = _round_up(B, 8)
    half = max(8, _round_up((b8 + 1) // 2, 8))
    block_m = max(8, min(block_m, half))
    b_pad = _round_up(B, block_m)
    grid = b_pad // block_m
    n_sub = 2 if (block_m % 16 == 0) else 1

    # Pad only the batch dim (no feature padding / no full x copy).
    if b_pad != B:
        x = jnp.pad(x, ((0, b_pad - B), (0, 0)))

    flops = 2 * b_pad * (obs_dim * HIDDEN + 2 * HIDDEN * HIDDEN + HIDDEN * OUT_PAD)
    transcendentals = b_pad * (3 + OUT_PAD)  # 3 rsqrt per row + tanh per output lane
    param_bytes = sum(int(p.size) * p.dtype.itemsize for p in params.values())
    bytes_accessed = int(x.size) * 4 + b_pad * OUT_PAD * 4 + param_bytes

    # Working-set-sized VMEM limit (matters on v5e's 16 MiB default scoped
    # limit at large block_m); stays well under v7x's 64 MiB physical VMEM.
    vmem_est = (2 * param_bytes
                + 2 * block_m * (obs_dim + OUT_PAD) * 4
                + 16 * block_m * HIDDEN * 4)
    vmem_limit = int(min(max(2 * vmem_est, 32 << 20), 48 << 20))

    out = pl.pallas_call(
        functools.partial(actor_kernel, max_action=float(max_action), n_sub=n_sub),
        out_shape=jax.ShapeDtypeStruct((b_pad, OUT_PAD), jnp.float32),
        grid=(grid,),
        in_specs=[
            pl.BlockSpec((block_m, obs_dim), lambda i: (i, 0)),      # batch-tiled input
            pl.BlockSpec((obs_dim, HIDDEN), lambda i: (0, 0)),       # VMEM-resident weights
            pl.BlockSpec((2, HIDDEN, HIDDEN), lambda i: (0, 0, 0)),
            pl.BlockSpec((HIDDEN, OUT_PAD), lambda i: (0, 0)),
            pl.BlockSpec((10, HIDDEN), lambda i: (0, 0)),
        ],
        out_specs=pl.BlockSpec((block_m, OUT_PAD), lambda i: (i, 0)),
        compiler_params=pltpu.CompilerParams(
            dimension_semantics=("parallel",),
            vmem_limit_bytes=vmem_limit,
        ),
        cost_estimate=pl.CostEstimate(
            flops=flops,
            transcendentals=transcendentals,
            bytes_accessed=bytes_accessed,
        ),
    )(x, params["w1"], params["w23"], params["wout"], params["vec"])

    return out[:B, :act_dim]


def actor_reference(x, params, *, max_action, act_dim):
    """Pure-JAX f32 reference (two-pass LayerNorm, matches nn.LayerNorm)."""
    x = x.astype(jnp.float32)
    w1 = params["w1"].astype(jnp.float32)
    w2 = params["w23"][0].astype(jnp.float32)
    w3 = params["w23"][1].astype(jnp.float32)
    wout = params["wout"][:, :act_dim].astype(jnp.float32)
    v = params["vec"]
    b1, g1, be1 = v[0], v[1], v[2]
    b2, g2, be2 = v[3], v[4], v[5]
    b3, g3, be3 = v[6], v[7], v[8]
    bout = v[9, :act_dim]

    def ln_relu(h, g, b):
        mu = jnp.mean(h, axis=-1, keepdims=True)
        var = jnp.mean((h - mu) ** 2, axis=-1, keepdims=True)
        return jnp.maximum((h - mu) / jnp.sqrt(var + LN_EPS) * g + b, 0.0)

    h = ln_relu(x @ w1 + b1, g1, be1)
    h = ln_relu(h @ w2 + b2, g2, be2)
    h = ln_relu(h @ w3 + b3, g3, be3)
    return max_action * jnp.tanh(h @ wout + bout)


if __name__ == "__main__":
    key = jax.random.PRNGKey(0)
    k_x1, k_x2, k_p = jax.random.split(key, 3)

    OBS, ACT = 24, 8
    MAX_ACTION = 2.0
    params = make_actor_params(k_p, OBS, ACT)

    # Test 1: tiny batch -> block_m clamps to 8, grid=2 (megacore path).
    B1 = 16
    x1 = jax.random.normal(k_x1, (B1, OBS), jnp.float32)
    act1 = actor_forward(x1, params, max_action=MAX_ACTION, act_dim=ACT)
    jax.block_until_ready(act1)
    ref1 = actor_reference(x1, params, max_action=MAX_ACTION, act_dim=ACT)
    assert act1.shape == (B1, ACT), act1.shape
    assert jnp.allclose(act1, ref1, atol=2e-2, rtol=2e-2), (act1, ref1)
    assert bool(jnp.all(jnp.abs(act1) <= MAX_ACTION + 1e-5))

    # Test 2: larger batch (non-multiple of tile) -> block_m=512, batch padding,
    # 2-way row sub-tiling, multi-step grid.
    B2 = 1040
    x2 = jax.random.normal(k_x2, (B2, OBS), jnp.float32)
    act2 = actor_forward(x2, params, max_action=MAX_ACTION, act_dim=ACT)
    jax.block_until_ready(act2)
    ref2 = actor_reference(x2, params, max_action=MAX_ACTION, act_dim=ACT)
    assert act2.shape == (B2, ACT), act2.shape
    assert jnp.allclose(act2, ref2, atol=2e-2, rtol=2e-2)
    assert bool(jnp.all(jnp.abs(act2) <= MAX_ACTION + 1e-5))

    print("KERNEL_OK")
</pallas_src>

<mosaic_0001>
module attributes {stable_mosaic.version = 11 : i64} {
  func.func @actor_kernel(%arg0: i32, %arg1: memref<8x24xf32, #tpu.memory_space<vmem>>, %arg2: memref<24x256xbf16, #tpu.memory_space<vmem>>, %arg3: memref<2x256x256xbf16, #tpu.memory_space<vmem>>, %arg4: memref<256x128xbf16, #tpu.memory_space<vmem>>, %arg5: memref<10x256xf32, #tpu.memory_space<vmem>>, %arg6: memref<8x128xf32, #tpu.memory_space<vmem>>) attributes {dimension_semantics = [#tpu.dimension_semantics<parallel>], iteration_bounds = array<i64: 2>, scalar_prefetch = 0 : i64, scratch_operands = 0 : i64, tpu.core_type = #tpu.core_type<tc>, window_params = [{transform_indices = @transform_0, window_bounds = array<i64: 8, 24>}, {pipeline_mode = #tpu.pipeline_mode<synchronous>, transform_indices = @transform_1, window_bounds = array<i64: 24, 256>}, {pipeline_mode = #tpu.pipeline_mode<synchronous>, transform_indices = @transform_2, window_bounds = array<i64: 2, 256, 256>}, {pipeline_mode = #tpu.pipeline_mode<synchronous>, transform_indices = @transform_3, window_bounds = array<i64: 256, 128>}, {pipeline_mode = #tpu.pipeline_mode<synchronous>, transform_indices = @transform_4, window_bounds = array<i64: 10, 256>}, {transform_indices = @transform_5, window_bounds = array<i64: 8, 128>}]} {
    %c0 = arith.constant 0 : index
    %c0_0 = arith.constant 0 : index
    %0 = vector.load %arg5[%c0, %c0_0] : memref<10x256xf32, #tpu.memory_space<vmem>>, vector<1x256xf32>
    %c1 = arith.constant 1 : index
    %c0_1 = arith.constant 0 : index
    %1 = vector.load %arg5[%c1, %c0_1] : memref<10x256xf32, #tpu.memory_space<vmem>>, vector<1x256xf32>
    %c2 = arith.constant 2 : index
    %c0_2 = arith.constant 0 : index
    %2 = vector.load %arg5[%c2, %c0_2] : memref<10x256xf32, #tpu.memory_space<vmem>>, vector<1x256xf32>
    %c3 = arith.constant 3 : index
    %c0_3 = arith.constant 0 : index
    %3 = vector.load %arg5[%c3, %c0_3] : memref<10x256xf32, #tpu.memory_space<vmem>>, vector<1x256xf32>
    %c4 = arith.constant 4 : index
    %c0_4 = arith.constant 0 : index
    %4 = vector.load %arg5[%c4, %c0_4] : memref<10x256xf32, #tpu.memory_space<vmem>>, vector<1x256xf32>
    %c5 = arith.constant 5 : index
    %c0_5 = arith.constant 0 : index
    %5 = vector.load %arg5[%c5, %c0_5] : memref<10x256xf32, #tpu.memory_space<vmem>>, vector<1x256xf32>
    %c6 = arith.constant 6 : index
    %c0_6 = arith.constant 0 : index
    %6 = vector.load %arg5[%c6, %c0_6] : memref<10x256xf32, #tpu.memory_space<vmem>>, vector<1x256xf32>
    %c7 = arith.constant 7 : index
    %c0_7 = arith.constant 0 : index
    %7 = vector.load %arg5[%c7, %c0_7] : memref<10x256xf32, #tpu.memory_space<vmem>>, vector<1x256xf32>
    %c8 = arith.constant 8 : index
    %c0_8 = arith.constant 0 : index
    %8 = vector.load %arg5[%c8, %c0_8] : memref<10x256xf32, #tpu.memory_space<vmem>>, vector<1x256xf32>
    %c9 = arith.constant 9 : index
    %c0_9 = arith.constant 0 : index
    %9 = vector.load %arg5[%c9, %c0_9] : memref<10x256xf32, #tpu.memory_space<vmem>>, vector<1x128xf32>
    %c0_10 = arith.constant 0 : index
    %c0_11 = arith.constant 0 : index
    %10 = vector.load %arg2[%c0_10, %c0_11] : memref<24x256xbf16, #tpu.memory_space<vmem>>, vector<24x256xbf16>
    %c0_12 = arith.constant 0 : index
    %c0_13 = arith.constant 0 : index
    %c0_14 = arith.constant 0 : index
    %11 = vector.load %arg3[%c0_12, %c0_13, %c0_14] : memref<2x256x256xbf16, #tpu.memory_space<vmem>>, vector<1x256x256xbf16>
    %12 = vector.shape_cast %11 : vector<1x256x256xbf16> to vector<256x256xbf16>
    %c1_15 = arith.constant 1 : index
    %c0_16 = arith.constant 0 : index
    %c0_17 = arith.constant 0 : index
    %13 = vector.load %arg3[%c1_15, %c0_16, %c0_17] : memref<2x256x256xbf16, #tpu.memory_space<vmem>>, vector<1x256x256xbf16>
    %14 = vector.shape_cast %13 : vector<1x256x256xbf16> to vector<256x256xbf16>
    %c0_18 = arith.constant 0 : index
    %c0_19 = arith.constant 0 : index
    %15 = vector.load %arg4[%c0_18, %c0_19] : memref<256x128xbf16, #tpu.memory_space<vmem>>, vector<256x128xbf16>
    %c0_20 = arith.constant 0 : index
    %c0_21 = arith.constant 0 : index
    %16 = vector.load %arg1[%c0_20, %c0_21] : memref<8x24xf32, #tpu.memory_space<vmem>>, vector<8x24xf32>
    %17 = arith.truncf %16 : vector<8x24xf32> to vector<8x24xbf16>
    %cst = arith.constant dense<0.000000e+00> : vector<8x256xf32>
    %18 = tpu.matmul %17, %10, %cst {dimension_numbers = #tpu.dot_dimension_numbers<[1], [0], [0], [1], [0, 0, 1, 1], [], []>} : vector<8x24xbf16>, vector<24x256xbf16>, vector<8x256xf32> -> vector<8x256xf32>
    %19 = vector.broadcast %0 : vector<1x256xf32> to vector<8x256xf32>
    %20 = arith.addf %18, %19 : vector<8x256xf32>
    %cst_22 = arith.constant dense<0.000000e+00> : vector<8xf32>
    %21 = vector.multi_reduction <add>, %20, %cst_22 [1] : vector<8x256xf32> to vector<8xf32>
    %22 = vector.shape_cast %21 : vector<8xf32> to vector<8x1xf32>
    %cst_23 = arith.constant 2.560000e+02 : f32
    %23 = vector.broadcast %cst_23 : f32 to vector<8x1xf32>
    %24 = arith.divf %22, %23 : vector<8x1xf32>
    %25 = arith.mulf %20, %20 : vector<8x256xf32>
    %cst_24 = arith.constant dense<0.000000e+00> : vector<8xf32>
    %26 = vector.multi_reduction <add>, %25, %cst_24 [1] : vector<8x256xf32> to vector<8xf32>
    %27 = vector.shape_cast %26 : vector<8xf32> to vector<8x1xf32>
    %cst_25 = arith.constant 2.560000e+02 : f32
    %28 = vector.broadcast %cst_25 : f32 to vector<8x1xf32>
    %29 = arith.divf %27, %28 : vector<8x1xf32>
    %30 = arith.mulf %24, %24 : vector<8x1xf32>
    %31 = arith.subf %29, %30 : vector<8x1xf32>
    %cst_26 = arith.constant 0.000000e+00 : f32
    %32 = vector.broadcast %cst_26 : f32 to vector<8x1xf32>
    %33 = arith.maximumf %31, %32 : vector<8x1xf32>
    %34 = vector.broadcast %24 : vector<8x1xf32> to vector<8x256xf32>
    %35 = arith.subf %20, %34 : vector<8x256xf32>
    %cst_27 = arith.constant 9.99999974E-6 : f32
    %36 = vector.broadcast %cst_27 : f32 to vector<8x1xf32>
    %37 = arith.addf %33, %36 : vector<8x1xf32>
    %38 = math.rsqrt %37 : vector<8x1xf32>
    %39 = vector.broadcast %38 : vector<8x1xf32> to vector<8x256xf32>
    %40 = arith.mulf %35, %39 : vector<8x256xf32>
    %41 = vector.broadcast %1 : vector<1x256xf32> to vector<8x256xf32>
    %42 = arith.mulf %40, %41 : vector<8x256xf32>
    %43 = vector.broadcast %2 : vector<1x256xf32> to vector<8x256xf32>
    %44 = arith.addf %42, %43 : vector<8x256xf32>
    %cst_28 = arith.constant 0.000000e+00 : f32
    %45 = vector.broadcast %cst_28 : f32 to vector<8x256xf32>
    %46 = arith.maximumf %44, %45 : vector<8x256xf32>
    %47 = arith.truncf %46 : vector<8x256xf32> to vector<8x256xbf16>
    %cst_29 = arith.constant dense<0.000000e+00> : vector<8x256xf32>
    %48 = tpu.matmul %47, %12, %cst_29 {dimension_numbers = #tpu.dot_dimension_numbers<[1], [0], [0], [1], [0, 0, 1, 1], [], []>} : vector<8x256xbf16>, vector<256x256xbf16>, vector<8x256xf32> -> vector<8x256xf32>
    %49 = vector.broadcast %3 : vector<1x256xf32> to vector<8x256xf32>
    %50 = arith.addf %48, %49 : vector<8x256xf32>
    %cst_30 = arith.constant dense<0.000000e+00> : vector<8xf32>
    %51 = vector.multi_reduction <add>, %50, %cst_30 [1] : vector<8x256xf32> to vector<8xf32>
    %52 = vector.shape_cast %51 : vector<8xf32> to vector<8x1xf32>
    %cst_31 = arith.constant 2.560000e+02 : f32
    %53 = vector.broadcast %cst_31 : f32 to vector<8x1xf32>
    %54 = arith.divf %52, %53 : vector<8x1xf32>
    %55 = arith.mulf %50, %50 : vector<8x256xf32>
    %cst_32 = arith.constant dense<0.000000e+00> : vector<8xf32>
    %56 = vector.multi_reduction <add>, %55, %cst_32 [1] : vector<8x256xf32> to vector<8xf32>
    %57 = vector.shape_cast %56 : vector<8xf32> to vector<8x1xf32>
    %cst_33 = arith.constant 2.560000e+02 : f32
    %58 = vector.broadcast %cst_33 : f32 to vector<8x1xf32>
    %59 = arith.divf %57, %58 : vector<8x1xf32>
    %60 = arith.mulf %54, %54 : vector<8x1xf32>
    %61 = arith.subf %59, %60 : vector<8x1xf32>
    %cst_34 = arith.constant 0.000000e+00 : f32
    %62 = vector.broadcast %cst_34 : f32 to vector<8x1xf32>
    %63 = arith.maximumf %61, %62 : vector<8x1xf32>
    %64 = vector.broadcast %54 : vector<8x1xf32> to vector<8x256xf32>
    %65 = arith.subf %50, %64 : vector<8x256xf32>
    %cst_35 = arith.constant 9.99999974E-6 : f32
    %66 = vector.broadcast %cst_35 : f32 to vector<8x1xf32>
    %67 = arith.addf %63, %66 : vector<8x1xf32>
    %68 = math.rsqrt %67 : vector<8x1xf32>
    %69 = vector.broadcast %68 : vector<8x1xf32> to vector<8x256xf32>
    %70 = arith.mulf %65, %69 : vector<8x256xf32>
    %71 = vector.broadcast %4 : vector<1x256xf32> to vector<8x256xf32>
    %72 = arith.mulf %70, %71 : vector<8x256xf32>
    %73 = vector.broadcast %5 : vector<1x256xf32> to vector<8x256xf32>
    %74 = arith.addf %72, %73 : vector<8x256xf32>
    %cst_36 = arith.constant 0.000000e+00 : f32
    %75 = vector.broadcast %cst_36 : f32 to vector<8x256xf32>
    %76 = arith.maximumf %74, %75 : vector<8x256xf32>
    %77 = arith.truncf %76 : vector<8x256xf32> to vector<8x256xbf16>
    %cst_37 = arith.constant dense<0.000000e+00> : vector<8x256xf32>
    %78 = tpu.matmul %77, %14, %cst_37 {dimension_numbers = #tpu.dot_dimension_numbers<[1], [0], [0], [1], [0, 0, 1, 1], [], []>} : vector<8x256xbf16>, vector<256x256xbf16>, vector<8x256xf32> -> vector<8x256xf32>
    %79 = vector.broadcast %6 : vector<1x256xf32> to vector<8x256xf32>
    %80 = arith.addf %78, %79 : vector<8x256xf32>
    %cst_38 = arith.constant dense<0.000000e+00> : vector<8xf32>
    %81 = vector.multi_reduction <add>, %80, %cst_38 [1] : vector<8x256xf32> to vector<8xf32>
    %82 = vector.shape_cast %81 : vector<8xf32> to vector<8x1xf32>
    %cst_39 = arith.constant 2.560000e+02 : f32
    %83 = vector.broadcast %cst_39 : f32 to vector<8x1xf32>
    %84 = arith.divf %82, %83 : vector<8x1xf32>
    %85 = arith.mulf %80, %80 : vector<8x256xf32>
    %cst_40 = arith.constant dense<0.000000e+00> : vector<8xf32>
    %86 = vector.multi_reduction <add>, %85, %cst_40 [1] : vector<8x256xf32> to vector<8xf32>
    %87 = vector.shape_cast %86 : vector<8xf32> to vector<8x1xf32>
    %cst_41 = arith.constant 2.560000e+02 : f32
    %88 = vector.broadcast %cst_41 : f32 to vector<8x1xf32>
    %89 = arith.divf %87, %88 : vector<8x1xf32>
    %90 = arith.mulf %84, %84 : vector<8x1xf32>
    %91 = arith.subf %89, %90 : vector<8x1xf32>
    %cst_42 = arith.constant 0.000000e+00 : f32
    %92 = vector.broadcast %cst_42 : f32 to vector<8x1xf32>
    %93 = arith.maximumf %91, %92 : vector<8x1xf32>
    %94 = vector.broadcast %84 : vector<8x1xf32> to vector<8x256xf32>
    %95 = arith.subf %80, %94 : vector<8x256xf32>
    %cst_43 = arith.constant 9.99999974E-6 : f32
    %96 = vector.broadcast %cst_43 : f32 to vector<8x1xf32>
    %97 = arith.addf %93, %96 : vector<8x1xf32>
    %98 = math.rsqrt %97 : vector<8x1xf32>
    %99 = vector.broadcast %98 : vector<8x1xf32> to vector<8x256xf32>
    %100 = arith.mulf %95, %99 : vector<8x256xf32>
    %101 = vector.broadcast %7 : vector<1x256xf32> to vector<8x256xf32>
    %102 = arith.mulf %100, %101 : vector<8x256xf32>
    %103 = vector.broadcast %8 : vector<1x256xf32> to vector<8x256xf32>
    %104 = arith.addf %102, %103 : vector<8x256xf32>
    %cst_44 = arith.constant 0.000000e+00 : f32
    %105 = vector.broadcast %cst_44 : f32 to vector<8x256xf32>
    %106 = arith.maximumf %104, %105 : vector<8x256xf32>
    %107 = arith.truncf %106 : vector<8x256xf32> to vector<8x256xbf16>
    %cst_45 = arith.constant dense<0.000000e+00> : vector<8x128xf32>
    %108 = tpu.matmul %107, %15, %cst_45 {dimension_numbers = #tpu.dot_dimension_numbers<[1], [0], [0], [1], [0, 0, 1, 1], [], []>} : vector<8x256xbf16>, vector<256x128xbf16>, vector<8x128xf32> -> vector<8x128xf32>
    %109 = vector.broadcast %9 : vector<1x128xf32> to vector<8x128xf32>
    %110 = arith.addf %108, %109 : vector<8x128xf32>
    %111 = math.tanh %110 : vector<8x128xf32>
    %cst_46 = arith.constant 2.000000e+00 : f32
    %112 = vector.broadcast %cst_46 : f32 to vector<8x128xf32>
    %113 = arith.mulf %112, %111 : vector<8x128xf32>
    %c0_47 = arith.constant 0 : index
    %c0_48 = arith.constant 0 : index
    %114 = vector.load %arg6[%c0_47, %c0_48] : memref<8x128xf32, #tpu.memory_space<vmem>>, vector<8x128xf32>
    tpu.vector_store %arg6[%c0_47, %c0_48], %113 {strides = array<i32>} : memref<8x128xf32, #tpu.memory_space<vmem>>, vector<8x128xf32>,
    return
  }
  func.func @transform_0(%arg0: i32) -> (i32, i32) {
    %c0_i32 = arith.constant 0 : i32
    %c0_i32_0 = arith.constant 0 : i32
    return %arg0, %c0_i32 : i32, i32
  }
  func.func @transform_1(%arg0: i32) -> (i32, i32) {
    %c0_i32 = arith.constant 0 : i32
    %c0_i32_0 = arith.constant 0 : i32
    %c0_i32_1 = arith.constant 0 : i32
    return %c0_i32, %c0_i32_0 : i32, i32
  }
  func.func @transform_2(%arg0: i32) -> (i32, i32, i32) {
    %c0_i32 = arith.constant 0 : i32
    %c0_i32_0 = arith.constant 0 : i32
    %c0_i32_1 = arith.constant 0 : i32
    %c0_i32_2 = arith.constant 0 : i32
    return %c0_i32, %c0_i32_0, %c0_i32_1 : i32, i32, i32
  }
  func.func @transform_3(%arg0: i32) -> (i32, i32) {
    %c0_i32 = arith.constant 0 : i32
    %c0_i32_0 = arith.constant 0 : i32
    %c0_i32_1 = arith.constant 0 : i32
    return %c0_i32, %c0_i32_0 : i32, i32
  }
  func.func @transform_4(%arg0: i32) -> (i32, i32) {
    %c0_i32 = arith.constant 0 : i32
    %c0_i32_0 = arith.constant 0 : i32
    %c0_i32_1 = arith.constant 0 : i32
    return %c0_i32, %c0_i32_0 : i32, i32
  }
  func.func @transform_5(%arg0: i32) -> (i32, i32) {
    %c0_i32 = arith.constant 0 : i32
    %c0_i32_0 = arith.constant 0 : i32
    return %arg0, %c0_i32 : i32, i32
  }
}

</mosaic_0001>

<bundles_post_ra>
// kernel: actor_forward.1
= control target key start
LH: loop header
LB: loop body
LE: loop exit
PB: predicated region body
PF: predicated region fallthrough
CT: control target
= control target key end

     0   :  { %10 = vsyncpa [#allocation3], 0  ;;  %s2148_s0 = inlined_call_operand.hbm [shape: f32[16,24], index: 0, kind: input, shape index: {}]   ;;  %s2149_s1 = inlined_call_operand.hbm [shape: bf16[24,256], index: 1, kind: input, shape index: {}]   ;;  %s2150_s2 = inlined_call_operand.hbm [shape: bf16[2,256,256], index: 2, kind: input, shape index: {}]   ;;  %s2151_s3 = inlined_call_operand.hbm [shape: bf16[256,128], index: 3, kind: input, shape index: {}]   ;;  %s2152_s4 = inlined_call_operand.hbm [shape: f32[10,256], index: 4, kind: input, shape index: {}]   ;;  %s2153_s5 = inlined_call_operand.vmem [shape: f32[16,128], index: 5, kind: output, shape index: {}]  }
   0x1   :  { %12 = vsyncpa [#allocation3 + $0x1], 0 }
   0x2   :  { %13 = vsyncpa [#allocation5], 0 }
   0x3   :  { %14 = vsyncpa [#allocation8], 0  ;;  %s1877_s18 = smov 0   ;;  %s1879_s19 = smov 0  }
   0x4   :  { %s1881_s20 = smov 0   ;;  %s1883_s21 = smov 0  }
   0x5 LB: > { %s1835_s22 = smov [#allocation4]   ;;  %s1898_s24 = sadd.s32 4294967295, %s1833_s21   ;;  %s1833_s21 = sphi %s1883_s21, %s2170_s21   ;;  %s1829_s20 = sphi %s1881_s20, %s2169_s20   ;;  %s1825_s19 = sphi %s1879_s19, %s2168_s19   ;;  %s1821_s18 = sphi %s1877_s18, %s2167_s18  }
   0x6   : > { %s173_s23 = sshll.u32 %s1835_s22, 4  ;;  %p1312_p0 = scmp.ge.s32.totalorder %s1833_s21, 1  ;;  %s1903_s23 = int_to_ptr.vmem [resolvable:$true] %s173_s23 }
   0x7   : > { %p2154_p1 = scmp.eq.s32.totalorder %s1898_s24, 0  ;;  %p161_p2 = scmp.lt.s32.totalorder %s1833_s21, 3 }
   0x8   : > { %s1836_s26 = smov [#allocation7]   ;;  %s1837_s29 = smov [#allocation6]  }
   0x9   : > { %p1905_p3 = pnand %p1312_p0, %p161_p2  ;;  %s199_s27 = sshll.u32 %s1836_s26, 4  ;;  %s1917_s27 = int_to_ptr.vmem [resolvable:$true] %s199_s27 }
   0xa   : > { %s1919_s30 = sshll.u32 %s1837_s29, 4  ;;  %s1649_s8 = scalar_lea.hbm %s2149_s1, 384  ;;  %s187_s30 = int_to_ptr.vmem [resolvable:$true] %s1919_s30 }
   0xb   : > { %s2156_s25 = scalar_select %p1905_p3, 1, 0 }
   0xc   : > { %p1455_p4 = pneg %p1905_p3  ;;  %p1650_p6 = scmp.ne.s32.totalorder %s2149_s1, %s1649_s8 }
   0xd   : > { %p1656_p10 = scmp.lt.u32.totalorder %s1649_s8, %s2149_s1 }
   0xe   : > { %p1913_p5 = pnand %p1455_p4, %p2154_p1 }
  0x10   : > { %p1929_p7 = pneg %p1913_p5 }
  0x12   : > { %p1652_p8 = pnand %p1929_p7, %p1650_p6 }
  0x14   : > { %p1653_p9 = pneg %p1652_p8 }
  0x16   : > { %p1658_p11 = pnand %p1656_p10, %p1653_p9 }
  0x18   : > { %1661 = shalt.err (!%p1658_p11)
}
  0x19   : > { %s1662_s14 = scalar_lea.vmem %s1903_s23, 384  ;;  %p1670_p2 = scmp.lt.s32.totalorder %s1903_s23, %s1903_s23 }
  0x1a   : > { %p1663_p12 = scmp.ne.s32.totalorder %s1903_s23, %s1662_s14  ;;  %p1671_p4 = scmp.lt.s32.totalorder %s1662_s14, %s1662_s14 }
  0x1c   : > { %p1665_p13 = pnand %p1663_p12, %p1929_p7  ;;  %p1672_p6 = por %p1671_p4, %p1670_p2 }
  0x1e   : > { %p1666_p0 = pneg %p1665_p13 }
  0x20   : > { %p1673_p8 = pnand %p1672_p6, %p1666_p0 }
  0x22   : > { %1676 = shalt.err (!%p1673_p8)
}
  0x23   : > { %s1838_s15 = smov 128   ;;  %s1839_s16 = smov 8  }
  0x24   : > { %1458 = dma.hbm_to_vmem [thread:$0]  (!%p1913_p5), %s2149_s1, 384, %s1903_s23, [#allocation5], %s1838_s15, %s1838_s15, %s1839_s16  }
  0x25   : > { %s1677_s6 = scalar_lea.hbm %s2151_s3, 2048 }
  0x26   : > { %p1678_p9 = scmp.ne.s32.totalorder %s2151_s3, %s1677_s6  ;;  %p1684_p12 = scmp.lt.u32.totalorder %s1677_s6, %s2151_s3 }
  0x28   : > { %p1680_p10 = pnand %p1678_p9, %p1929_p7 }
  0x2a   : > { %p1681_p11 = pneg %p1680_p10 }
  0x2c   : > { %p1686_p13 = pnand %p1684_p12, %p1681_p11 }
  0x2e   : > { %1689 = shalt.err (!%p1686_p13)
}
  0x2f   : > { %s1690_s23 = scalar_lea.vmem %s1917_s27, 2048  ;;  %p1698_p6 = scmp.lt.s32.totalorder %s1917_s27, %s1917_s27 }
  0x30   : > { %p1691_p0 = scmp.ne.s32.totalorder %s1917_s27, %s1690_s23  ;;  %p1699_p8 = scmp.lt.s32.totalorder %s1690_s23, %s1690_s23 }
  0x32   : > { %p1693_p2 = pnand %p1691_p0, %p1929_p7  ;;  %p1700_p9 = por %p1699_p8, %p1698_p6 }
  0x34   : > { %p1694_p4 = pneg %p1693_p2 }
  0x36   : > { %p1701_p10 = pnand %p1700_p9, %p1694_p4 }
  0x38   : > { %1704 = shalt.err (!%p1701_p10)
}
  0x39   : > { %s1840_s12 = smov 64   ;;  %s1841_s13 = smov 4  }
  0x3a   : > { %1464 = dma.hbm_to_vmem [thread:$0]  (!%p1913_p5), %s2151_s3, 2048, %s1917_s27, [#allocation8], %s1840_s12, %s1840_s12, %s1841_s13  }
  0x3b   : > { %s1705_s29 = scalar_lea.hbm %s2150_s2, 8192 }
  0x3c   : > { %p1706_p11 = scmp.ne.s32.totalorder %s2150_s2, %s1705_s29  ;;  %p1712_p0 = scmp.lt.u32.totalorder %s1705_s29, %s2150_s2 }
  0x3e   : > { %p1708_p12 = pnand %p1706_p11, %p1929_p7 }
  0x40   : > { %p1709_p13 = pneg %p1708_p12 }
  0x42   : > { %p1714_p2 = pnand %p1712_p0, %p1709_p13 }
  0x44   : > { %1717 = shalt.err (!%p1714_p2)
}
  0x45   : > { %s1718_s10 = scalar_lea.vmem %s187_s30, 8192  ;;  %p1726_p9 = scmp.lt.s32.totalorder %s187_s30, %s187_s30 }
  0x46   : > { %p1719_p4 = scmp.ne.s32.totalorder %s187_s30, %s1718_s10  ;;  %p1727_p10 = scmp.lt.s32.totalorder %s1718_s10, %s1718_s10 }
  0x48   : > { %p1721_p6 = pnand %p1719_p4, %p1929_p7  ;;  %p1728_p1 = por %p1727_p10, %p1726_p9 }
  0x4a   : > { %p1722_p8 = pneg %p1721_p6 }
  0x4c   : > { %p1729_p3 = pnand %p1728_p1, %p1722_p8 }
  0x4e   : > { %1732 = shalt.err (!%p1729_p3)
}
  0x4f   : > { %1461 = dma.hbm_to_vmem [thread:$0]  (!%p1913_p5), %s2150_s2, 8192, %s187_s30, [#allocation5], %s1838_s15, %s1838_s15, %s1839_s16  }
  0x50   : > { %s1842_s12 = smov [#allocation9]   ;;  %s1733_s22 = scalar_lea.hbm %s2152_s4, 512 }
  0x51   : > { %s212_s13 = sshll.u32 %s1842_s12, 4  ;;  %p1734_p1 = scmp.ne.s32.totalorder %s2152_s4, %s1733_s22  ;;  %s213_s13 = int_to_ptr.vmem [resolvable:$true] %s212_s13 }
  0x52   : > { %p1740_p12 = scmp.lt.u32.totalorder %s1733_s22, %s2152_s4 }
  0x53   : > { %p1736_p3 = pnand %p1734_p1, %p1929_p7 }
  0x55   : > { %p1737_p11 = pneg %p1736_p3 }
  0x57   : > { %p1742_p13 = pnand %p1740_p12, %p1737_p11 }
  0x59   : > { %1745 = shalt.err (!%p1742_p13)
}
  0x5a   : > { %s1746_s30 = scalar_lea.vmem %s213_s13, 512  ;;  %p1754_p6 = scmp.lt.s32.totalorder %s213_s13, %s213_s13 }
  0x5b   : > { %p1747_p0 = scmp.ne.s32.totalorder %s213_s13, %s1746_s30  ;;  %p1755_p8 = scmp.lt.s32.totalorder %s1746_s30, %s1746_s30 }
  0x5d   : > { %p1749_p2 = pnand %p1747_p0, %p1929_p7  ;;  %p1756_p9 = por %p1755_p8, %p1754_p6 }
  0x5f   : > { %p1750_p4 = pneg %p1749_p2 }
  0x61   : > { %p1757_p10 = pnand %p1756_p9, %p1750_p4 }
  0x63   : > { %1760 = shalt.err (!%p1757_p10)
}
  0x64   : > { %s1843_s15 = smov 256   ;;  %s1844_s11 = smov 16  }
  0x65   : > { %1467 = dma.hbm_to_vmem [thread:$0]  (!%p1913_p5), %s2152_s4, 512, %s213_s13, [#allocation8], %s1843_s15, %s1843_s15, %s1844_s11  }
  0x66   : > { %s2017_s9 = sadd.s32 1, %s1833_s21   ;;  %s27_s10 = sadd.s32 1, %s1829_s20 }
  0x67   : > { %s24_s27 = ssub.s32 %s1833_s21, %s2017_s9  ;;  %p34_p7 = scmp.ne.s32.totalorder %s1829_s20, %s1825_s19 }
  0x68   : > { %p25_p1 = scmp.eq.s32.totalorder %s24_s27, 0  ;;  %p35_p3 = scmp.eq.s32.totalorder %s1833_s21, 0 }
  0x69   : > { %p40_p11 = scmp.ne.s32.totalorder %s1825_s19, %s1821_s18  ;;  %p1476_p12 = scmp.lt.s32.totalorder %s1833_s21, 2 }
  0x6a   : > { %s2029_s23 = scalar_select %p25_p1, %s1829_s20, %s27_s10  }
  0x6b   : > { %p36_p13 = por %p35_p3, %p34_p7  ;;  %p2159_p0 = scmp.eq.s32.totalorder %s1898_s24, 0 }
  0x6c   : > { %s226_s12 = sand.u32 1, %s1829_s20   ;;  %s1319_s13 = sshll.u32 %s1833_s21, 7 }
  0x6d   : > { %p2033_p2 = por %p2159_p0, %p40_p11  ;;  %s1318_s14 = sshll.u32 %s226_s12, 3 }
  0x6e   : > { %s2042_s26 = scalar_lea.hbm %s2148_s0, %s1319_s13  ;;  %s230_s18 = scalar_lea.vmem [#allocation2], %s1318_s14 }
  0x6f   : > { %s237_s29 = sshll.u32 %s230_s18, 4  ;;  %p2044_p5 = pnand %p1476_p12, %p36_p13  ;;  %s2048_s29 = int_to_ptr.vmem [resolvable:$true] %s237_s29 }
  0x70   : > { %s227_s21 = scalar_lea.sflag [#allocation3], %s226_s12  ;;  %s1761_s7 = scalar_lea.hbm %s2042_s26, 128 }
  0x71   : > { %p1762_p4 = scmp.ne.s32.totalorder %s2042_s26, %s1761_s7  ;;  %p1763_p6 = pneg %p2044_p5 }
  0x72   : > { %s1766_s11 = scalar_lea.hbm %s2148_s0, 256  ;;  %p1767_p10 = scmp.lt.u32.totalorder %s2042_s26, %s2148_s0 }
  0x73   : > { %p1764_p8 = pnand %p1763_p6, %p1762_p4  ;;  %p1768_p7 = scmp.lt.u32.totalorder %s1766_s11, %s1761_s7 }
  0x74   : > { %p1770_p3 = scmp.lt.u32.totalorder %s1761_s7, %s2042_s26 }
  0x75   : > { %p1765_p9 = pneg %p1764_p8  ;;  %p1769_p1 = por %p1768_p7, %p1767_p10 }
  0x77   : > { %p1771_p11 = por %p1770_p3, %p1769_p1 }
  0x79   : > { %p1772_p12 = pnand %p1771_p11, %p1765_p9 }
  0x7b   : > { %1775 = shalt.err (!%p1772_p12)
}
  0x7c   : > { %s1776_s10 = scalar_lea.vmem %s2048_s29, 128  ;;  %s1845_s27 = smov [#allocation2]  }
  0x7d   : > { %p1777_p13 = scmp.ne.s32.totalorder %s2048_s29, %s1776_s10  ;;  %s1781_s12 = sshll.u32 %s1845_s27, 4  ;;  %s1782_s12 = int_to_ptr.vmem [resolvable:$false] %s1781_s12 }
  0x7e   : > { %s1783_s13 = scalar_lea.vmem %s1782_s12, 256  ;;  %p1784_p8 = scmp.lt.s32.totalorder %s2048_s29, %s1782_s12 }
  0x7f   : > { %p1779_p0 = pnand %p1777_p13, %p1763_p6  ;;  %p1785_p10 = scmp.lt.s32.totalorder %s1783_s13, %s1776_s10 }
  0x81   : > { %p1780_p4 = pneg %p1779_p0  ;;  %p1786_p7 = por %p1785_p10, %p1784_p8 }
  0x83   : > { %p1787_p1 = pnand %p1786_p7, %p1780_p4 }
  0x85   : > { %1790 = shalt.err (!%p1787_p1)
}
  0x86   : > { %1471 = dma.hbm_to_vmem [thread:$0]  (!%p2044_p5), %s2042_s26, 128, %s2048_s29, %s227_s21  }
  0x87   : > { %p2162_p9 = scmp.ne.s32.totalorder %s2156_s25, 0 }
  0x88   : > { %s248_s14 = sand.u32 (!%p2162_p9), 1, %s1825_s19  }
  0x89   : > { %246 = sbr.rel (%p2162_p9) target bundleno = 1569 (0x621), region = 40  ;;  %s1321_s17 = sshll.u32 (!%p2162_p9), %s248_s14, 3 }
  0x8a   : > { %s249_s22 = scalar_lea.sflag (!%p2162_p9), [#allocation3], %s248_s14  ;;  %s252_s18 = scalar_lea.vmem (!%p2162_p9), [#allocation2], %s1321_s17 }
  0x90   : > { %1808 = dma.done.wait (%p2033_p2), %s249_s22, 128  }
  0x91   : > { %1810 = vsyncadd (%p2033_p2), %s249_s22, 4294967168  ;;  %p2163_p6 = scmp.eq.s32.totalorder %s1898_s24, 0 }
  0x93   : > { %1812 = dma.done.wait (%p2163_p6), [#allocation5], 8576   ;;  %p2164_p3 = pmov %p2163_p6 }
  0x95   : > { %1814 = vsyncadd (%p2164_p3), [#allocation5], 4294958720  ;;  %p2165_p5 = pmov %p2164_p3 }
  0x96   : > { %p2166_p11 = pmov %p2164_p3 }
  0x97   : > { %1816 = dma.done.wait (%p2165_p5), [#allocation8], 2560  }
  0x98   : > { %1818 = vsyncadd (%p2166_p11), [#allocation8], 4294964736  ;;  %v1846_v0 = vmov 0   ;;  %v1524_v1 = vld [vmem:[#allocation4 + $0x4] ss:$8 sps:$4 sm:$0xff]   ;;  %v319_v3 = vld [vmem:[#allocation4 + $0x10] sm:$0xff]  ;;  %v420_v25 = vlaneseq }
  0x99   : > { %488 = vmatprep.mubr.bf16.mxu0 %v1846_v0  ;;  %v1526_v2 = vld [vmem:[#allocation4] ss:$8 sps:$4 sm:$0xff]   ;;  %vm449_vm0 = vcmask 1043456   ;;  %456 = vmatprep.subr.bf16.mxu0 %v1524_v1  ;;  %v1330_v4 = vcombine.high %v319_v3, %v319_v3  ;;  %v1329_v5 = vcombine.low %v319_v3, %v319_v3  ;;  %v417_v6 = vld [vmem:[%s252_s18] sm:$0xff]  ;;  %vm445_vm1 = vcmask 195584   ;;  %p294_p2 = scmp.lt.s32.totalorder %s1898_s24, 1 }
  0x9a   : > { %457 = vmatpush1.bf16.msra.mxu0 %v1526_v2  ;;  %v418_v8 = vpack.c.bf16 %v417_v6, %v417_v6  ;;  %v1529_v9 = vld [vmem:[#allocation6 + $0x4] ss:$8 sps:$4 sm:$0xff]   ;;  %v1531_v10 = vld [vmem:[#allocation6] ss:$8 sps:$4 sm:$0xff]   ;;  %v1532_v11 = vld [vmem:[#allocation6 + $0x14] ss:$8 sps:$4 sm:$0xff]  }
  0x9b   : > { %1331 = vmatprep.subr.msk.bf16.mxu0 %vm449_vm0, %v1330_v4  ;;  %v451_v7 = vsel %vm449_vm0, %v1329_v5, 0  ;;  %718 = vmatprep.subr.bf16.mxu1 %v1529_v9  ;;  %v1534_v12 = vld [vmem:[#allocation6 + $0x10] ss:$8 sps:$4 sm:$0xff]   ;;  %v1535_v13 = vld [vmem:[#allocation6 + $0x24] ss:$8 sps:$4 sm:$0xff]   ;;  %v421_v26 = vshrl.u32 %v420_v25, 7 }
  0x9c   : > { %719 = vmatpush1.bf16.msra.mxu1 %v1531_v10  ;;  %v1537_v14 = vld [vmem:[#allocation6 + $0x20] ss:$8 sps:$4 sm:$0xff]   ;;  %v1538_v15 = vld [vmem:[#allocation6 + $0x34] ss:$8 sps:$4 sm:$0xff]   ;;  %v1540_v16 = vld [vmem:[#allocation6 + $0x30] ss:$8 sps:$4 sm:$0xff]  }
  0x9d   : > { %720 = vmatprep.subr.bf16.mxu1 %v1532_v11  ;;  %v1541_v17 = vld [vmem:[#allocation6 + $0x44] ss:$8 sps:$4 sm:$0xff]   ;;  %v1543_v18 = vld [vmem:[#allocation6 + $0x40] ss:$8 sps:$4 sm:$0xff]   ;;  %v1544_v19 = vld [vmem:[#allocation6 + $0x54] ss:$8 sps:$4 sm:$0xff]  }
  0x9e   : > { %459 = vmatpush1.bf16.msra.mxu0 %v451_v7  ;;  %v1546_v20 = vld [vmem:[#allocation6 + $0x50] ss:$8 sps:$4 sm:$0xff]   ;;  %v1547_v21 = vld [vmem:[#allocation6 + $0x64] ss:$8 sps:$4 sm:$0xff]   ;;  %v1549_v22 = vld [vmem:[#allocation6 + $0x60] ss:$8 sps:$4 sm:$0xff]  }
  0x9f   : > { %v1550_v23 = vld [vmem:[#allocation6 + $0x74] ss:$8 sps:$4 sm:$0xff]   ;;  %v1552_v24 = vld [vmem:[#allocation6 + $0x70] ss:$8 sps:$4 sm:$0xff]   ;;  %v2090_v27 = vsub.s32 0, %v421_v26  ;;  %v2092_v29 = vsub.s32 1, %v421_v26 }
  0xa0   : > { %721 = vmatpush1.bf16.msra.mxu1 %v1534_v12  ;;  %v299_v28 = vld [vmem:[#allocation9] ss:$8 sm:$0x3]  ;;  %v1553_v42 = vld [vmem:[#allocation6 + $0x84] ss:$8 sps:$4 sm:$0xff]   ;;  %s2172_s24 = smov (!%p294_p2, %s1898_s24), 1 }
  0xa1   : > { %1332 = vmatmul.mubr.msk.bf16.vlgmr.msra.gmra.mrb[0].mxu0 %vm445_vm1, %v418_v8  ;;  %722 = vmatprep.subr.bf16.mxu1 %v1535_v13  ;;  %v423_v30 = vrot.slane %v299_v28, %v2090_v27  ;;  %v427_v31 = vrot.slane %v299_v28, %v2092_v29  ;;  %v1555_v43 = vld [vmem:[#allocation6 + $0x80] ss:$8 sps:$4 sm:$0xff]   ;;  %v1556_v44 = vld [vmem:[#allocation6 + $0x94] ss:$8 sps:$4 sm:$0xff]   ;;  %v1558_v45 = vld [vmem:[#allocation6 + $0x90] ss:$8 sps:$4 sm:$0xff]  }
  0xa2   : > { %v1559_v46 = vld [vmem:[#allocation6 + $0xa4] ss:$8 sps:$4 sm:$0xff]   ;;  %v1561_v47 = vld [vmem:[#allocation6 + $0xa0] ss:$8 sps:$4 sm:$0xff]   ;;  %v1562_v48 = vld [vmem:[#allocation6 + $0xb4] ss:$8 sps:$4 sm:$0xff]  }
  0xa3   : > { %v1564_v49 = vld [vmem:[#allocation6 + $0xb0] ss:$8 sps:$4 sm:$0xff]   ;;  %v1565_v50 = vld [vmem:[#allocation6 + $0xc4] ss:$8 sps:$4 sm:$0xff]   ;;  %v1567_v51 = vld [vmem:[#allocation6 + $0xc0] ss:$8 sps:$4 sm:$0xff]  }
  0xa4   : > { %723 = vmatpush1.bf16.msra.mxu1 %v1537_v14  ;;  %v1568_v52 = vld [vmem:[#allocation6 + $0xd4] ss:$8 sps:$4 sm:$0xff]   ;;  %v1570_v53 = vld [vmem:[#allocation6 + $0xd0] ss:$8 sps:$4 sm:$0xff]   ;;  %v1571_v54 = vld [vmem:[#allocation6 + $0xe4] ss:$8 sps:$4 sm:$0xff]  }
  0xa5   : > { %724 = vmatprep.subr.bf16.mxu1 %v1538_v15  ;;  %v1573_v55 = vld [vmem:[#allocation6 + $0xe0] ss:$8 sps:$4 sm:$0xff]   ;;  %v1574_v56 = vld [vmem:[#allocation6 + $0xf4] ss:$8 sps:$4 sm:$0xff]   ;;  %v1576_v57 = vld [vmem:[#allocation6 + $0xf0] ss:$8 sps:$4 sm:$0xff]  }
  0xa6   : > { %v301_v2 = vld [vmem:[#allocation9 + $0x1] ss:$8 sm:$0x3]  ;;  %v303_v3 = vld [vmem:[#allocation9 + $0x2] ss:$8 sm:$0x3] }
  0xa7   : > { %v521_v6 = vrot.slane %v301_v2, %v2090_v27  ;;  %v525_v7 = vrot.slane %v301_v2, %v2092_v29  ;;  %v534_v10 = vrot.slane %v303_v3, %v2090_v27  ;;  %v538_v11 = vrot.slane %v303_v3, %v2092_v29  ;;  %v1585_v25 = vld [vmem:[#allocation6 + $0x124] ss:$8 sps:$4 sm:$0xff]   ;;  %v1583_v26 = vld [vmem:[#allocation6 + $0x120] ss:$8 sps:$4 sm:$0xff]   ;;  %v1588_v28 = vld [vmem:[#allocation6 + $0x134] ss:$8 sps:$4 sm:$0xff]  }
  0xa8   : > { %725 = vmatpush1.bf16.msra.mxu1 %v1540_v16  ;;  %v1624_v2 = vld [vmem:[#allocation6 + $0x1f4] ss:$8 sps:$4 sm:$0xff]   ;;  %v1622_v3 = vld [vmem:[#allocation6 + $0x1f0] ss:$8 sps:$4 sm:$0xff]   ;;  %s1326_s25 = sshll.u32 %s2172_s24, 3 }
  0xa9   : > { %726 = vmatprep.subr.bf16.mxu1 %v1541_v17  ;;  %s297_s29 = scalar_lea.vmem %s2153_s5, %s1326_s25 }
  0xac   : > { %727 = vmatpush1.bf16.msra.mxu1 %v1543_v18 }
  0xad   : > { %728 = vmatprep.subr.bf16.mxu1 %v1544_v19 }
  0xb0   : > { %729 = vmatpush1.bf16.msra.mxu1 %v1546_v20 }
  0xb1   : > { %730 = vmatprep.subr.bf16.mxu1 %v1547_v21  ;;  %v1577_v21 = vld [vmem:[#allocation6 + $0x100] ss:$8 sps:$4 sm:$0xff]  }
  0xb4   : > { %731 = vmatpush1.bf16.msra.mxu1 %v1549_v22  ;;  %v1579_v22 = vld [vmem:[#allocation6 + $0x104] ss:$8 sps:$4 sm:$0xff]  }
  0xb5   : > { %732 = vmatprep.subr.bf16.mxu1 %v1550_v23  ;;  %v1582_v23 = vld [vmem:[#allocation6 + $0x114] ss:$8 sps:$4 sm:$0xff]   ;;  %979 = vmatprep.subr.bf16.mxu0 %v1579_v22 }
  0xb6   : > { %980 = vmatpush1.bf16.msra.mxu0 %v1577_v21 }
  0xb7   : > { %981 = vmatprep.subr.bf16.mxu0 %v1582_v23 }
  0xb8   : > { %733 = vmatpush1.bf16.msra.mxu1 %v1552_v24  ;;  %v1580_v24 = vld [vmem:[#allocation6 + $0x110] ss:$8 sps:$4 sm:$0xff]  }
  0xb9   : > { %734 = vmatprep.subr.bf16.mxu1 %v1553_v42 }
  0xba   : > { %982 = vmatpush1.bf16.msra.mxu0 %v1580_v24 }
  0xbb   : > { %983 = vmatprep.subr.bf16.mxu0 %v1585_v25 }
  0xbc   : > { %735 = vmatpush1.bf16.msra.mxu1 %v1555_v43 }
  0xbd   : > { %736 = vmatprep.subr.bf16.mxu1 %v1556_v44 }
  0xbe   : > { %984 = vmatpush1.bf16.msra.mxu0 %v1583_v26 }
  0xbf   : > { %985 = vmatprep.subr.bf16.mxu0 %v1588_v28 }
  0xc0   : > { %737 = vmatpush1.bf16.msra.mxu1 %v1558_v45 }
  0xc1   : > { %738 = vmatprep.subr.bf16.mxu1 %v1559_v46 }
  0xc4   : > { %739 = vmatpush1.bf16.msra.mxu1 %v1561_v47 }
  0xc5   : > { %740 = vmatprep.subr.bf16.mxu1 %v1562_v48 }
  0xc8   : > { %741 = vmatpush1.bf16.msra.mxu1 %v1564_v49 }
  0xc9   : > { %742 = vmatprep.subr.bf16.mxu1 %v1565_v50 }
  0xcc   : > { %743 = vmatpush1.bf16.msra.mxu1 %v1567_v51 }
  0xcd   : > { %744 = vmatprep.subr.bf16.mxu1 %v1568_v52  ;;  %v1603_v52 = vld [vmem:[#allocation6 + $0x184] ss:$8 sps:$4 sm:$0xff]  }
  0xd0   : > { %745 = vmatpush1.bf16.msra.mxu1 %v1570_v53  ;;  %v1601_v53 = vld [vmem:[#allocation6 + $0x180] ss:$8 sps:$4 sm:$0xff]  }
  0xd1   : > { %746 = vmatprep.subr.bf16.mxu1 %v1571_v54  ;;  %v1606_v54 = vld [vmem:[#allocation6 + $0x194] ss:$8 sps:$4 sm:$0xff]  }
  0xd4   : > { %747 = vmatpush1.bf16.msra.mxu1 %v1573_v55  ;;  %v1604_v55 = vld [vmem:[#allocation6 + $0x190] ss:$8 sps:$4 sm:$0xff]  }
  0xd5   : > { %748 = vmatprep.subr.bf16.mxu1 %v1574_v56  ;;  %v1609_v56 = vld [vmem:[#allocation6 + $0x1a4] ss:$8 sps:$4 sm:$0xff]  }
  0xd8   : > { %749 = vmatpush1.bf16.msra.mxu1 %v1576_v57  ;;  %v1607_v57 = vld [vmem:[#allocation6 + $0x1a0] ss:$8 sps:$4 sm:$0xff]  }
 0x174   : > { %v490_v32 = vpop.f32.mrb[0].mxu0 }
 0x175   : > { %v2096_v33 = vadd.f32 %v490_v32, %v423_v30  ;;  %v492_v34 = vpop.f32.mrb[1].mxu0  ;;  %v1586_v30 = vld [vmem:[#allocation6 + $0x130] ss:$8 sps:$4 sm:$0xff]   ;;  %v1589_v32 = vld [vmem:[#allocation6 + $0x140] ss:$8 sps:$4 sm:$0xff]  }
 0x176   : > { %v493_v35 = vadd.f32 %v492_v34, %v427_v31  ;;  %v494_v36 = vpop.f32.mrb[2].mxu0  ;;  %v1591_v31 = vld [vmem:[#allocation6 + $0x144] ss:$8 sps:$4 sm:$0xff]   ;;  %986 = vmatpush1.bf16.msra.mxu0 %v1586_v30  ;;  %v1592_v34 = vld [vmem:[#allocation6 + $0x150] ss:$8 sps:$4 sm:$0xff]  }
 0x177   : > { %v495_v37 = vpop.f32.mrb[3].mxu0  ;;  %v502_v39 = vmul.f32 %v2096_v33, %v2096_v33  ;;  %987 = vmatprep.subr.bf16.mxu0 %v1591_v31  ;;  %v1595_v36 = vld [vmem:[#allocation6 + $0x160] ss:$8 sps:$4 sm:$0xff]  }
 0x178   : > { %v497_v38 = vadd.f32 %v493_v35, %v2096_v33  ;;  %v503_v40 = vmul.f32 %v493_v35, %v493_v35  ;;  %v1600_v37 = vld [vmem:[#allocation6 + $0x174] ss:$8 sps:$4 sm:$0xff]  }
 0x17a   : > { %498 = vadd.xlane.f32.xlu0 %v497_v38  ;;  %v504_v41 = vadd.f32 %v503_v40, %v502_v39  ;;  %988 = vmatpush1.bf16.msra.mxu0 %v1589_v32  ;;  %v1598_v38 = vld [vmem:[#allocation6 + $0x170] ss:$8 sps:$4 sm:$0xff]   ;;  %v305_v39 = vld [vmem:[#allocation9 + $0x3] ss:$8 sm:$0x3] }
 0x17b   : > { %v551_v40 = vrot.slane %v305_v39, %v2090_v27 }
 0x17e   : > { %505 = vadd.xlane.f32.xlu0 %v504_v41  ;;  %v555_v41 = vrot.slane %v305_v39, %v2092_v29 }
 0x207   : > { %v499_v58 = vpop.xlane.xlu0 %498 }
 0x208   : > { %v501_v59 = vmul.f32 0.00390625, %v499_v58  ;;  %v1610_v58 = vld [vmem:[#allocation6 + $0x1b0] ss:$8 sps:$4 sm:$0xff]  }
 0x20a   : > { %v508_v61 = vmul.f32 %v501_v59, %v501_v59  ;;  %v511_v4 = vsub.f32 %v2096_v33, %v501_v59  ;;  %v512_v5 = vsub.f32 %v493_v35, %v501_v59  ;;  %v1594_v33 = vld [vmem:[#allocation6 + $0x154] ss:$8 sps:$4 sm:$0xff]   ;;  %v1597_v35 = vld [vmem:[#allocation6 + $0x164] ss:$8 sps:$4 sm:$0xff]  }
 0x20b   : > { %v506_v60 = vpop.xlane.xlu0 %505  ;;  %989 = vmatprep.subr.bf16.mxu0 %v1594_v33  ;;  %v1612_v59 = vld [vmem:[#allocation6 + $0x1b4] ss:$8 sps:$4 sm:$0xff]   ;;  %v311_v33 = vld [vmem:[#allocation9 + $0x6] ss:$8 sm:$0x3] }
 0x20c   : > { %v507_v62 = vmul.f32 0.00390625, %v506_v60  ;;  %990 = vmatpush1.bf16.msra.mxu0 %v1592_v34  ;;  %v1615_v60 = vld [vmem:[#allocation6 + $0x1c4] ss:$8 sps:$4 sm:$0xff]   ;;  %v812_v34 = vrot.slane %v311_v33, %v2090_v27 }
 0x20d   : > { %991 = vmatprep.subr.bf16.mxu0 %v1597_v35  ;;  %v816_v35 = vrot.slane %v311_v33, %v2092_v29 }
 0x20e   : > { %v509_v63 = vsub.f32 %v507_v62, %v508_v61  ;;  %v1613_v61 = vld [vmem:[#allocation6 + $0x1c0] ss:$8 sps:$4 sm:$0xff]   ;;  %v1618_v62 = vld [vmem:[#allocation6 + $0x1d4] ss:$8 sps:$4 sm:$0xff]  }
 0x210   : > { %v510_v0 = vmax.f32 %v509_v63, 0.0  ;;  %992 = vmatpush1.bf16.msra.mxu0 %v1595_v36  ;;  %v1616_v63 = vld [vmem:[#allocation6 + $0x1d0] ss:$8 sps:$4 sm:$0xff]  }
 0x211   : > { %993 = vmatprep.subr.bf16.mxu0 %v1600_v37 }
 0x212   : > { %v513_v1 = vadd.f32 1e-05, %v510_v0  ;;  %v1621_v0 = vld [vmem:[#allocation6 + $0x1e4] ss:$8 sps:$4 sm:$0xff]  }
 0x214   : > { %1641 = vrsqrt.f32 %v513_v1  ;;  %994 = vmatpush1.bf16.msra.mxu0 %v1598_v38  ;;  %v1619_v1 = vld [vmem:[#allocation6 + $0x1e0] ss:$8 sps:$4 sm:$0xff]  }
 0x215   : > { %995 = vmatprep.subr.bf16.mxu0 %v1603_v52  ;;  %v1631_v52 = vld [vmem:[#allocation7 + $0x58] sm:$0xff]  }
 0x218   : > { %996 = vmatpush1.bf16.msra.mxu0 %v1601_v53  ;;  %v1632_v53 = vld [vmem:[#allocation7 + $0x18] sm:$0xff]  }
 0x219   : > { %997 = vmatprep.subr.bf16.mxu0 %v1606_v54  ;;  %v1633_v54 = vld [vmem:[#allocation7 + $0x60] sm:$0xff]  }
 0x21c   : > { %998 = vmatpush1.bf16.msra.mxu0 %v1604_v55  ;;  %v1634_v55 = vld [vmem:[#allocation7 + $0x20] sm:$0xff]  }
 0x21d   : > { %999 = vmatprep.subr.bf16.mxu0 %v1609_v56  ;;  %v1635_v56 = vld [vmem:[#allocation7 + $0x68] sm:$0xff]  }
 0x21e   : > { %v1642_v8 = vpop.eup %1641 }
 0x21f   : > { %v516_v9 = vmul.f32 %v1642_v8, %v512_v5  ;;  %v515_v12 = vmul.f32 %v1642_v8, %v511_v4 }
 0x220   : > { %1000 = vmatpush1.bf16.msra.mxu0 %v1607_v57  ;;  %v1636_v57 = vld [vmem:[#allocation7 + $0x28] sm:$0xff]  }
 0x221   : > { %v529_v13 = vmul.f32 %v525_v7, %v516_v9  ;;  %v528_v14 = vmul.f32 %v521_v6, %v515_v12  ;;  %1001 = vmatprep.subr.bf16.mxu0 %v1612_v59  ;;  %v307_v12 = vld [vmem:[#allocation9 + $0x4] ss:$8 sm:$0x3]  ;;  %v1638_v59 = vld [vmem:[#allocation7 + $0x30] sm:$0xff]  }
 0x223   : > { %v542_v15 = vadd.f32 %v538_v11, %v529_v13  ;;  %v541_v16 = vadd.f32 %v534_v10, %v528_v14  ;;  %v309_v13 = vld [vmem:[#allocation9 + $0x5] ss:$8 sm:$0x3] }
 0x224   : > { %1002 = vmatpush1.bf16.msra.mxu0 %v1610_v58  ;;  %v799_v21 = vrot.slane %v309_v13, %v2092_v29  ;;  %v1637_v58 = vld [vmem:[#allocation7 + $0x70] sm:$0xff]  }
 0x225   : > { %v544_v17 = vmax.f32 %v542_v15, 0.0  ;;  %v543_v18 = vmax.f32 %v541_v16, 0.0  ;;  %1003 = vmatprep.subr.bf16.mxu0 %v1615_v60  ;;  %v782_v16 = vrot.slane %v307_v12, %v2090_v27  ;;  %v1639_v60 = vld [vmem:[#allocation7 + $0x78] sm:$0xff]  }
 0x227   : > { %v546_v19 = vpack.c.bf16 %v544_v17, %v544_v17  ;;  %v545_v20 = vpack.c.bf16 %v543_v18, %v543_v18  ;;  %v786_v17 = vrot.slane %v307_v12, %v2092_v29 }
 0x228   : > { %1004 = vmatpush1.bf16.msra.mxu0 %v1613_v61  ;;  %v1640_v61 = vld [vmem:[#allocation7 + $0x38] sm:$0xff]  }
 0x229   : > { %750 = vmatprep.mubr.bf16.mxu1 %v546_v19  ;;  %1005 = vmatprep.subr.bf16.mxu0 %v1618_v62 }
 0x22a   : > { %751 = vmatmul.mubr.bf16.vlgmr.msra.gmra.mrb[0].mxu1 %v545_v20  ;;  %v795_v20 = vrot.slane %v309_v13, %v2090_v27 }
 0x22c   : > { %1006 = vmatpush1.bf16.msra.mxu0 %v1616_v63 }
 0x22d   : > { %1007 = vmatprep.subr.bf16.mxu0 %v1621_v0 }
 0x230   : > { %1008 = vmatpush1.bf16.msra.mxu0 %v1619_v1 }
 0x231   : > { %1009 = vmatprep.subr.bf16.mxu0 %v1624_v2 }
 0x234   : > { %1010 = vmatpush1.bf16.msra.mxu0 %v1622_v3 }
 0x2fd   : > { %v752_v42 = vpop.f32.mrb[0].mxu1 }
 0x2fe   : > { %v2108_v43 = vadd.f32 %v752_v42, %v551_v40  ;;  %v754_v44 = vpop.f32.mrb[1].mxu1 }
 0x2ff   : > { %v755_v45 = vadd.f32 %v754_v44, %v555_v41  ;;  %v756_v46 = vpop.f32.mrb[2].mxu1 }
 0x300   : > { %v757_v47 = vpop.f32.mrb[3].mxu1  ;;  %v763_v49 = vmul.f32 %v2108_v43, %v2108_v43  ;;  %v1625_v46 = vld [vmem:[#allocation7 + $0x40] sm:$0xff]  }
 0x301   : > { %v759_v48 = vadd.f32 %v755_v45, %v2108_v43  ;;  %v764_v50 = vmul.f32 %v755_v45, %v755_v45  ;;  %v1626_v47 = vld [vmem:[#allocation7] sm:$0xff]   ;;  %1415 = vmatprep.subr.bf16.mxu1 %v1625_v46 }
 0x302   : > { %1416 = vmatpush3.bf16.msra.mxu1 %v1626_v47 }
 0x303   : > { %760 = vadd.xlane.f32.xlu1 %v759_v48  ;;  %v765_v51 = vadd.f32 %v764_v50, %v763_v49  ;;  %v1627_v48 = vld [vmem:[#allocation7 + $0x48] sm:$0xff]   ;;  %v1629_v50 = vld [vmem:[#allocation7 + $0x50] sm:$0xff]  }
 0x304   : > { %v1628_v49 = vld [vmem:[#allocation7 + $0x8] sm:$0xff]   ;;  %1417 = vmatprep.subr.bf16.mxu1 %v1627_v48 }
 0x306   : > { %1418 = vmatpush3.bf16.msra.mxu1 %v1628_v49 }
 0x307   : > { %766 = vadd.xlane.f32.xlu1 %v765_v51  ;;  %v1630_v51 = vld [vmem:[#allocation7 + $0x10] sm:$0xff]   ;;  %1419 = vmatprep.subr.bf16.mxu1 %v1629_v50 }
 0x30a   : > { %1420 = vmatpush3.bf16.msra.mxu1 %v1630_v51 }
 0x30b   : > { %1421 = vmatprep.subr.bf16.mxu1 %v1631_v52 }
 0x30e   : > { %1422 = vmatpush3.bf16.msra.mxu1 %v1632_v53 }
 0x30f   : > { %1423 = vmatprep.subr.bf16.mxu1 %v1633_v54 }
 0x312   : > { %1424 = vmatpush3.bf16.msra.mxu1 %v1634_v55 }
 0x313   : > { %1425 = vmatprep.subr.bf16.mxu1 %v1635_v56 }
 0x316   : > { %1426 = vmatpush3.bf16.msra.mxu1 %v1636_v57 }
 0x317   : > { %1427 = vmatprep.subr.bf16.mxu1 %v1637_v58 }
 0x31a   : > { %1428 = vmatpush3.bf16.msra.mxu1 %v1638_v59 }
 0x31b   : > { %1429 = vmatprep.subr.bf16.mxu1 %v1639_v60 }
 0x31e   : > { %1430 = vmatpush3.bf16.msra.mxu1 %v1640_v61 }
 0x390   : > { %v761_v4 = vpop.xlane.xlu1 %760 }
 0x391   : > { %v762_v5 = vmul.f32 0.00390625, %v761_v4 }
 0x393   : > { %v769_v7 = vmul.f32 %v762_v5, %v762_v5  ;;  %v772_v14 = vsub.f32 %v2108_v43, %v762_v5  ;;  %v773_v15 = vsub.f32 %v755_v45, %v762_v5 }
 0x394   : > { %v767_v6 = vpop.xlane.xlu1 %766 }
 0x395   : > { %v768_v8 = vmul.f32 0.00390625, %v767_v6  ;;  %v313_v6 = vld [vmem:[#allocation9 + $0x7] ss:$8 sm:$0x3] }
 0x397   : > { %v770_v9 = vsub.f32 %v768_v8, %v769_v7  ;;  %v315_v7 = vld [vmem:[#allocation9 + $0x10] ss:$8 sm:$0x3] }
 0x399   : > { %v771_v10 = vmax.f32 %v770_v9, 0.0 }
 0x39b   : > { %v774_v11 = vadd.f32 1e-05, %v771_v10  ;;  %v1043_v10 = vrot.slane %v313_v6, %v2090_v27 }
 0x39d   : > { %1643 = vrsqrt.f32 %v774_v11  ;;  %v1047_v11 = vrot.slane %v313_v6, %v2092_v29 }
 0x3a7   : > { %v1644_v18 = vpop.eup %1643 }
 0x3a8   : > { %v777_v19 = vmul.f32 %v1644_v18, %v773_v15  ;;  %v776_v22 = vmul.f32 %v1644_v18, %v772_v14  ;;  %v1056_v14 = vrot.slane %v315_v7, %v2090_v27  ;;  %v1060_v15 = vrot.slane %v315_v7, %v2092_v29 }
 0x3aa   : > { %v790_v23 = vmul.f32 %v786_v17, %v777_v19  ;;  %v789_v24 = vmul.f32 %v782_v16, %v776_v22 }
 0x3ac   : > { %v803_v25 = vadd.f32 %v799_v21, %v790_v23  ;;  %v802_v26 = vadd.f32 %v795_v20, %v789_v24 }
 0x3ae   : > { %v805_v28 = vmax.f32 %v803_v25, 0.0  ;;  %v804_v30 = vmax.f32 %v802_v26, 0.0  ;;  %v316_v26 = vld [vmem:[#allocation9 + $0x11] ss:$0 sm:$0xff] }
 0x3b0   : > { %v807_v31 = vpack.c.bf16 %v805_v28, %v805_v28  ;;  %v806_v32 = vpack.c.bf16 %v804_v30, %v804_v30 }
 0x3b2   : > { %1011 = vmatprep.mubr.bf16.mxu0 %v807_v31 }
 0x3b3   : > { %1012 = vmatmul.mubr.bf16.vlgmr.msra.gmra.mrb[4].mxu0 %v806_v32 }
 0x486   : > { %v1013_v36 = vpop.f32.mrb[4].mxu0 }
 0x487   : > { %v2120_v37 = vadd.f32 %v1013_v36, %v812_v34  ;;  %v1015_v38 = vpop.f32.mrb[5].mxu0 }
 0x488   : > { %v1016_v39 = vadd.f32 %v1015_v38, %v816_v35  ;;  %v1017_v40 = vpop.f32.mrb[6].mxu0 }
 0x489   : > { %v1018_v41 = vpop.f32.mrb[7].mxu0  ;;  %v1024_v42 = vmul.f32 %v2120_v37, %v2120_v37 }
 0x48a   : > { %v1020_v43 = vadd.f32 %v1016_v39, %v2120_v37  ;;  %v1025_v44 = vmul.f32 %v1016_v39, %v1016_v39 }
 0x48c   : > { %1021 = vadd.xlane.f32.xlu0 %v1020_v43  ;;  %v1026_v45 = vadd.f32 %v1025_v44, %v1024_v42 }
 0x48e   : > { %1027 = vadd.xlane.f32.xlu1 %v1026_v45 }
 0x519   : > { %v1022_v62 = vpop.xlane.xlu0 %1021 }
 0x51a   : > { %v1023_v63 = vmul.f32 0.00390625, %v1022_v62 }
 0x51b   : > { %v1028_v0 = vpop.xlane.xlu1 %1027 }
 0x51c   : > { %v1029_v1 = vmul.f32 0.00390625, %v1028_v0  ;;  %v1030_v2 = vmul.f32 %v1023_v63, %v1023_v63  ;;  %v1033_v8 = vsub.f32 %v2120_v37, %v1023_v63  ;;  %v1034_v9 = vsub.f32 %v1016_v39, %v1023_v63 }
 0x51e   : > { %v1031_v3 = vsub.f32 %v1029_v1, %v1030_v2 }
 0x520   : > { %v1032_v4 = vmax.f32 %v1031_v3, 0.0 }
 0x522   : > { %v1035_v5 = vadd.f32 1e-05, %v1032_v4 }
 0x524   : > { %1645 = vrsqrt.f32 %v1035_v5 }
 0x52e   : > { %v1646_v12 = vpop.eup %1645 }
 0x52f   : > { %v1038_v13 = vmul.f32 %v1646_v12, %v1034_v9  ;;  %v1037_v16 = vmul.f32 %v1646_v12, %v1033_v8 }
 0x531   : > { %v1051_v17 = vmul.f32 %v1047_v11, %v1038_v13  ;;  %v1050_v18 = vmul.f32 %v1043_v10, %v1037_v16 }
 0x533   : > { %v1064_v19 = vadd.f32 %v1060_v15, %v1051_v17  ;;  %v1063_v20 = vadd.f32 %v1056_v14, %v1050_v18 }
 0x535   : > { %v1066_v21 = vmax.f32 %v1064_v19, 0.0  ;;  %v1065_v22 = vmax.f32 %v1063_v20, 0.0 }
 0x537   : > { %v1068_v23 = vpack.c.bf16 %v1066_v21, %v1066_v21  ;;  %v1067_v24 = vpack.c.bf16 %v1065_v22, %v1065_v22 }
 0x539   : > { %1197 = vmatprep.mubr.bf16.mxu1 %v1068_v23 }
 0x53a   : > { %1198 = vmatmul.mubr.bf16.vlgmr.msra.gmra.mrb[4].mxu1 %v1067_v24 }
 0x60d   : > { %v1431_v25 = vpop.f32.mrb[4].mxu1 }
 0x60e   : > { %v1432_v28 = vpop.f32.mrb[5].mxu1 }
 0x60f   : > { %v1433_v30 = vadd.f32 %v1432_v28, %v1431_v25  ;;  %v1434_v27 = vpop.f32.mrb[6].mxu1 }
 0x610   : > { %v1435_v31 = vpop.f32.mrb[7].mxu1 }
 0x611   : > { %v1200_v29 = vadd.f32 %v1433_v30, %v316_v26 }
 0x613   : > { %1647 = vtanh.f32 %v1200_v29 }
 0x61d   : > { %v1648_v32 = vpop.eup %1647 }
 0x61e   : > { %v1206_v33 = vmul.f32 2.0, %v1648_v32 }
 0x620   : > { %1207 = vst [vmem:[%s297_s29] sm:$0xff] %v1206_v33 }
 0x621 PF: > { %p17_p12 = scmp.ge.s32.totalorder %s2017_s9, 4   ;;  %s2167_s18 = smov %s1825_s19 }
 0x622   : > { %s2168_s19 = smov %s1829_s20  ;;  %s2169_s20 = smov %s2029_s23 }
 0x623   : > { %s2170_s21 = smov %s2017_s9  ;;  %19 = sbr.rel (!%p17_p12) target bundleno = 5 (0x5), region = 105 }
 0x62a   :  { %1227 = vsyncpa [#allocation3], 1 }
 0x62b   :  { %1229 = vsyncpa [#allocation3 + $0x1], 1 }
 0x62c   :  { %1230 = vsyncpa [#allocation5], 1 }
 0x62d   :  { %1231 = vsyncpa [#allocation8], 1 }

</bundles_post_ra>
